<compile_context>
chip_gen: v7x
topology: tpu7x:2x2x1
jax: 0.10.0
libtpu: 0.0.40
codegen_flags: <defaults>
</compile_context>

<pallas_src>
import jax
import jax.numpy as jnp
import numpy as np
from jax.experimental import pallas as pl
from jax.experimental.pallas import tpu as pltpu


# ---------------------------------------------------------------- Pallas kernel
def _stgcn_kernel(x_ref,     # VMEM (BB*N_pad, T*F)       node-major inputs, all periods (padded nodes = 0)
                  a_ref,     # VMEM (BB*N_pad, BB*N_pad)  kron(I_BB, padded D^-1/2 (A+I) D^-1/2)
                  w_ref,     # VMEM (T*F, 2*T*H)          fused [kron(I_T, Wz Lz) | kron(I_T, Wh Lh)]
                  b_ref,     # VMEM (1, 2*T*H)            fused biases, f32
                  r_ref,     # VMEM (T*H, H)              softmax(attention)[t]/N diagonal reduction, f32
                  s_ref,     # VMEM (BB, BB*N_pad)        block-row node mask (0 on padded node rows), f32
                  out_ref):  # VMEM (1, BB, H)
    TH = r_ref.shape[0]

    # 1) Gate/feature transform first (2*T*H output lanes, lane-dense), graph
    #    aggregation second.  A @ (X @ W) == (A @ X) @ W, so this is exact and
    #    avoids a VMEM scratch round-trip and lane-sparse per-sample matmuls.
    xw = jnp.dot(x_ref[...], w_ref[...], preferred_element_type=jnp.float32)
    pre = jnp.dot(a_ref[...], xw.astype(a_ref.dtype),
                  preferred_element_type=jnp.float32) + b_ref[...]

    # 2) Gates (H == 0 every period => H_t = (1 - Z_t) * Htilde_t).  Kept in f32 for
    #    every chip generation; on v6e/v7x (bf16 EUP/VPU) these could be bf16.
    z = jax.nn.sigmoid(pre[:, :TH])
    h_tilde = jnp.tanh(pre[:, TH:])
    h = (1.0 - z) * h_tilde                                       # (BB*N_pad, T*H)

    # 3) Attention-weighted period sum, 1/N node mean and padded-node masking as two
    #    small f32 matmuls — no cross-sublane reduce loops, no masked one-row stores.
    hr = jnp.dot(h, r_ref[...], preferred_element_type=jnp.float32)        # (BB*N_pad, H)
    out_ref[...] = jnp.dot(s_ref[...], hr, preferred_element_type=jnp.float32)[None]


# ---------------------------------------------------------------- glue / params
def gcn_norm_dense(num_nodes):
    """Dense D^-1/2 (A+I) D^-1/2 for fully_connected(num_nodes) directed edges i<j."""
    # in-degree of node i = i (edges from lower-index nodes) + 1 (self loop)
    deg = jnp.arange(1, num_nodes + 1, dtype=jnp.float32)
    dinv = 1.0 / jnp.sqrt(deg)
    return jnp.tril(dinv[:, None] * dinv[None, :])


def init_params(key, input_dim, gnn_hidden, periods):
    ks = jax.random.split(key, 13)
    u = lambda k, shape, s=0.1: jax.random.uniform(k, shape, jnp.float32, -s, s)
    return dict(
        attention=jax.random.uniform(ks[0], (periods,), jnp.float32),   # uniform_(0,1)
        conv_z_w=u(ks[1], (input_dim, gnn_hidden)),
        conv_r_w=u(ks[2], (input_dim, gnn_hidden)),
        conv_h_w=u(ks[3], (input_dim, gnn_hidden)),
        conv_z_b=u(ks[4], (gnn_hidden,)),
        conv_r_b=u(ks[5], (gnn_hidden,)),
        conv_h_b=u(ks[6], (gnn_hidden,)),
        lin_z_w=u(ks[7], (gnn_hidden, 2 * gnn_hidden)),
        lin_r_w=u(ks[8], (gnn_hidden, 2 * gnn_hidden)),
        lin_h_w=u(ks[9], (gnn_hidden, 2 * gnn_hidden)),
        lin_z_b=u(ks[10], (gnn_hidden,)),
        lin_r_b=u(ks[11], (gnn_hidden,)),
        lin_h_b=u(ks[12], (gnn_hidden,)),
    )


def _pick_block_batch(B, n_pad, *, max_rows=512):
    """Largest BB dividing B such that the grid has >= 2 steps (DMA pipelining and
    v7x dual-TensorCore sharding) while keeping BB*N_pad rows within an MXU-friendly
    / VMEM-friendly ceiling.  At real sizes (N_pad≈88–96) this yields M in the
    128–512 row range; at the toy size it yields BB=1, grid=(2,)."""
    bb = 1
    for cand in range(1, B + 1):
        if B % cand == 0 and (B // cand) >= 2 and cand * n_pad <= max_rows:
            bb = cand
    return bb


def stgcn_encoder_forward(params, x, *, matmul_dtype=jnp.float32, block_batch=None):
    """matmul_dtype=jnp.bfloat16 casts MXU operands only (f32 accumulate/activations);
    that path double-rounds the A stage, so relax numeric tolerances when using it."""
    agent_obs, hideout_obs, timestep_obs, num_agents = x
    agent_obs = agent_obs.astype(jnp.float32)
    hideout_obs = hideout_obs.astype(jnp.float32)
    timestep_obs = timestep_obs.astype(jnp.float32)

    B, T, N, F = agent_obs.shape
    H = params["conv_z_w"].shape[1]

    # ---- effective fused parameters (hidden state is zero every period) ----
    lz = params["lin_z_w"][:, :H].T                       # conv-half of linear_z, (H, H)
    lh = params["lin_h_w"][:, :H].T
    wz_eff = params["conv_z_w"] @ lz                      # (F, H)
    wh_eff = params["conv_h_w"] @ lh
    bz_eff = params["conv_z_b"] @ lz + params["lin_z_b"]  # (H,)  GCN bias folded through linear
    bh_eff = params["conv_h_b"] @ lh + params["lin_h_b"]

    eye_t = jnp.eye(T, dtype=jnp.float32)
    # block-diagonal over time so all T periods go through one matmul; z-cols then h-cols
    w_big = jnp.concatenate([jnp.kron(eye_t, wz_eff), jnp.kron(eye_t, wh_eff)], axis=1)  # (T*F, 2*T*H)
    b_big = jnp.concatenate([jnp.tile(bz_eff, T), jnp.tile(bh_eff, T)])[None, :]          # (1, 2*T*H)

    # softmax(attention)[t]/N folded into a diagonal reduction matrix (period sum + node mean)
    probs = jax.nn.softmax(params["attention"])
    r_mat = (probs[:, None, None] / N * jnp.eye(H, dtype=jnp.float32)).reshape(T * H, H)  # (T*H, H), f32

    # ---- sublane-aligned node padding and batch-block sizing ----
    sub = 8 if matmul_dtype == jnp.float32 else 16
    n_pad = ((N + sub - 1) // sub) * sub
    BB = _pick_block_batch(B, n_pad) if block_batch is None else block_batch
    assert B % BB == 0
    G = B // BB                       # grid steps; >= 2 -> x DMA pipelines, v7x uses both TCs
    M = BB * n_pad                    # rows of every per-block matmul (multiple of 8/16)

    # NOTE: the reference forward hard-codes the 83-node graph; here we build the
    # same fully-connected normalization for the actual node count N.
    # TODO(synk): original PyTorch forward always uses initialized_graphs[83] regardless of num_agents.
    a_hat = gcn_norm_dense(N)
    a_hat = jnp.pad(a_hat, ((0, n_pad - N), (0, n_pad - N)))               # zero rows/cols for padded nodes
    a_blk = jnp.kron(jnp.eye(BB, dtype=jnp.float32), a_hat)                # (M, M) per batch block only

    # block-row node mask: zeros on padded node rows so their bias-only gates never
    # reach the output (exact); 1/N is already inside r_mat.
    node_mask = (jnp.arange(n_pad) < N).astype(jnp.float32)
    s_mat = jnp.kron(jnp.eye(BB, dtype=jnp.float32), node_mask[None, :])   # (BB, M)

    # Node-major per-sample layout, zero-padded on the node axis, packed row-dense
    # so every per-block offset lands on a sublane boundary.
    x3 = jnp.transpose(agent_obs, (0, 2, 1, 3)).reshape(B, N, T * F)
    x3 = jnp.pad(x3, ((0, 0), (0, n_pad - N), (0, 0))).reshape(B * n_pad, T * F)

    x_flat = x3.astype(matmul_dtype)
    a_blk = a_blk.astype(matmul_dtype)
    w_blk = w_big.astype(matmul_dtype)
    # b_big / r_mat / s_mat and all activations stay f32 on every chip generation.

    inv = lambda shape: pl.BlockSpec(shape, lambda i: (0,) * len(shape))   # grid-invariant operands
    grid_spec = pltpu.PrefetchScalarGridSpec(
        num_scalar_prefetch=0,
        grid=(G,),
        in_specs=[
            pl.BlockSpec((M, T * F), lambda i: (i, 0)),   # only x streams per grid step
            inv((M, M)),
            inv((T * F, 2 * T * H)),
            inv((1, 2 * T * H)),
            inv((T * H, H)),
            inv((BB, M)),
        ],
        out_specs=pl.BlockSpec((1, BB, H), lambda i: (i, 0, 0)),
    )

    gnn_mean = pl.pallas_call(
        _stgcn_kernel,
        out_shape=jax.ShapeDtypeStruct((G, BB, H), jnp.float32),
        grid_spec=grid_spec,
        compiler_params=pltpu.CompilerParams(dimension_semantics=("parallel",)),
    )(x_flat, a_blk, w_blk, b_big, r_mat, s_mat)

    gnn_mean = gnn_mean.reshape(B, H)
    return jnp.concatenate([gnn_mean, hideout_obs, timestep_obs], axis=-1)


# ---------------------------------------------------------------- pure-JAX reference
def reference_forward(params, x):
    agent_obs, hideout_obs, timestep_obs, num_agents = x
    agent_obs = agent_obs.astype(jnp.float32)
    B, T, N, F = agent_obs.shape
    Hd = params["conv_z_w"].shape[1]
    a_hat = gcn_norm_dense(N)
    probs = jax.nn.softmax(params["attention"])
    X = jnp.transpose(agent_obs, (0, 2, 3, 1))                    # (B, N, F, T)
    h_accum = jnp.zeros((B, N, Hd), jnp.float32)
    for t in range(T):
        xt = X[..., t]
        conv_z = jnp.einsum("ij,bjf,fh->bih", a_hat, xt, params["conv_z_w"]) + params["conv_z_b"]
        conv_r = jnp.einsum("ij,bjf,fh->bih", a_hat, xt, params["conv_r_w"]) + params["conv_r_b"]
        conv_h = jnp.einsum("ij,bjf,fh->bih", a_hat, xt, params["conv_h_w"]) + params["conv_h_b"]
        h0 = jnp.zeros((B, N, Hd), jnp.float32)
        z = jax.nn.sigmoid(jnp.concatenate([conv_z, h0], -1) @ params["lin_z_w"].T + params["lin_z_b"])
        r = jax.nn.sigmoid(jnp.concatenate([conv_r, h0], -1) @ params["lin_r_w"].T + params["lin_r_b"])
        h_tilde = jnp.tanh(jnp.concatenate([conv_h, h0 * r], -1) @ params["lin_h_w"].T + params["lin_h_b"])
        h = z * h0 + (1.0 - z) * h_tilde
        h_accum = h_accum + probs[t] * h
    gnn_mean = h_accum.mean(axis=1)
    return jnp.concatenate(
        [gnn_mean, hideout_obs.astype(jnp.float32), timestep_obs.astype(jnp.float32)], axis=-1)


# ---------------------------------------------------------------- main
if __name__ == "__main__":
    key = jax.random.PRNGKey(0)
    B, T, N, F, Hd = 2, 8, 12, 4, 32     # batch, seq(periods), num_agents, input_dim, gnn_hidden
    kp, ka, kh, kt = jax.random.split(key, 4)

    params = init_params(kp, F, Hd, T)
    agent_obs = jax.random.normal(ka, (B, T, N, F), jnp.float32)
    hideout_obs = jax.random.normal(kh, (B, 2), jnp.float32)
    timestep_obs = jax.random.uniform(kt, (B, 1), jnp.float32)
    x = (agent_obs, hideout_obs, timestep_obs, N)

    out = stgcn_encoder_forward(params, x)          # f32 MXU path keeps the tight numeric check
    jax.block_until_ready(out)

    ref = reference_forward(params, x)
    assert out.shape == (B, Hd + hideout_obs.shape[-1] + timestep_obs.shape[-1])
    np.testing.assert_allclose(np.asarray(out), np.asarray(ref), rtol=1e-4, atol=1e-4)
    print("KERNEL_OK")
</pallas_src>

<mosaic_0001>
module attributes {stable_mosaic.version = 11 : i64} {
  func.func @_stgcn_kernel(%arg0: i32, %arg1: memref<16x32xf32, #tpu.memory_space<vmem>>, %arg2: memref<16x16xf32, #tpu.memory_space<vmem>>, %arg3: memref<32x512xf32, #tpu.memory_space<vmem>>, %arg4: memref<1x512xf32, #tpu.memory_space<vmem>>, %arg5: memref<256x32xf32, #tpu.memory_space<vmem>>, %arg6: memref<1x16xf32, #tpu.memory_space<vmem>>, %arg7: memref<1x1x32xf32, #tpu.memory_space<vmem>>) attributes {dimension_semantics = [#tpu.dimension_semantics<parallel>], iteration_bounds = array<i64: 2>, scalar_prefetch = 0 : i64, scratch_operands = 0 : i64, tpu.core_type = #tpu.core_type<tc>, window_params = [{transform_indices = @transform_0, window_bounds = array<i64: 16, 32>}, {pipeline_mode = #tpu.pipeline_mode<synchronous>, transform_indices = @transform_1, window_bounds = array<i64: 16, 16>}, {pipeline_mode = #tpu.pipeline_mode<synchronous>, transform_indices = @transform_2, window_bounds = array<i64: 32, 512>}, {pipeline_mode = #tpu.pipeline_mode<synchronous>, transform_indices = @transform_3, window_bounds = array<i64: 1, 512>}, {pipeline_mode = #tpu.pipeline_mode<synchronous>, transform_indices = @transform_4, window_bounds = array<i64: 256, 32>}, {pipeline_mode = #tpu.pipeline_mode<synchronous>, transform_indices = @transform_5, window_bounds = array<i64: 1, 16>}, {transform_indices = @transform_6, window_bounds = array<i64: 1, 1, 32>}]} {
    %c0 = arith.constant 0 : index
    %c0_0 = arith.constant 0 : index
    %0 = vector.load %arg1[%c0, %c0_0] : memref<16x32xf32, #tpu.memory_space<vmem>>, vector<16x32xf32>
    %c0_1 = arith.constant 0 : index
    %c0_2 = arith.constant 0 : index
    %1 = vector.load %arg3[%c0_1, %c0_2] : memref<32x512xf32, #tpu.memory_space<vmem>>, vector<32x512xf32>
    %cst = arith.constant dense<0.000000e+00> : vector<16x512xf32>
    %2 = tpu.matmul %0, %1, %cst {dimension_numbers = #tpu.dot_dimension_numbers<[1], [0], [0], [1], [0, 0, 1, 1], [], []>} : vector<16x32xf32>, vector<32x512xf32>, vector<16x512xf32> -> vector<16x512xf32>
    %c0_3 = arith.constant 0 : index
    %c0_4 = arith.constant 0 : index
    %3 = vector.load %arg2[%c0_3, %c0_4] : memref<16x16xf32, #tpu.memory_space<vmem>>, vector<16x16xf32>
    %cst_5 = arith.constant dense<0.000000e+00> : vector<16x512xf32>
    %4 = tpu.matmul %3, %2, %cst_5 {dimension_numbers = #tpu.dot_dimension_numbers<[1], [0], [0], [1], [0, 0, 1, 1], [], []>} : vector<16x16xf32>, vector<16x512xf32>, vector<16x512xf32> -> vector<16x512xf32>
    %c0_6 = arith.constant 0 : index
    %c0_7 = arith.constant 0 : index
    %5 = vector.load %arg4[%c0_6, %c0_7] : memref<1x512xf32, #tpu.memory_space<vmem>>, vector<1x512xf32>
    %6 = vector.broadcast %5 : vector<1x512xf32> to vector<16x512xf32>
    %7 = arith.addf %4, %6 : vector<16x512xf32>
    %8 = vector.extract_strided_slice %7 {offsets = [0, 0], sizes = [16, 256], strides = [1, 1]} : vector<16x512xf32> to vector<16x256xf32>
    %9 = arith.negf %8 : vector<16x256xf32>
    %10 = math.exp %9 : vector<16x256xf32>
    %cst_8 = arith.constant 1.000000e+00 : f32
    %11 = vector.broadcast %cst_8 : f32 to vector<16x256xf32>
    %12 = arith.addf %11, %10 : vector<16x256xf32>
    %13 = arith.divf %11, %12 : vector<16x256xf32>
    %14 = vector.extract_strided_slice %7 {offsets = [0, 256], sizes = [16, 256], strides = [1, 1]} : vector<16x512xf32> to vector<16x256xf32>
    %15 = math.tanh %14 : vector<16x256xf32>
    %cst_9 = arith.constant 1.000000e+00 : f32
    %16 = vector.broadcast %cst_9 : f32 to vector<16x256xf32>
    %17 = arith.subf %16, %13 : vector<16x256xf32>
    %18 = arith.mulf %17, %15 : vector<16x256xf32>
    %c0_10 = arith.constant 0 : index
    %c0_11 = arith.constant 0 : index
    %19 = vector.load %arg5[%c0_10, %c0_11] : memref<256x32xf32, #tpu.memory_space<vmem>>, vector<256x32xf32>
    %cst_12 = arith.constant dense<0.000000e+00> : vector<16x32xf32>
    %20 = tpu.matmul %18, %19, %cst_12 {dimension_numbers = #tpu.dot_dimension_numbers<[1], [0], [0], [1], [0, 0, 1, 1], [], []>} : vector<16x256xf32>, vector<256x32xf32>, vector<16x32xf32> -> vector<16x32xf32>
    %c0_13 = arith.constant 0 : index
    %c0_14 = arith.constant 0 : index
    %21 = vector.load %arg6[%c0_13, %c0_14] : memref<1x16xf32, #tpu.memory_space<vmem>>, vector<1x16xf32>
    %cst_15 = arith.constant dense<0.000000e+00> : vector<1x32xf32>
    %22 = tpu.matmul %21, %20, %cst_15 {dimension_numbers = #tpu.dot_dimension_numbers<[1], [0], [0], [1], [0, 0, 1, 1], [], []>} : vector<1x16xf32>, vector<16x32xf32>, vector<1x32xf32> -> vector<1x32xf32>
    %23 = vector.shape_cast %22 : vector<1x32xf32> to vector<1x1x32xf32>
    %c0_16 = arith.constant 0 : index
    %c0_17 = arith.constant 0 : index
    %c0_18 = arith.constant 0 : index
    %24 = vector.load %arg7[%c0_16, %c0_17, %c0_18] : memref<1x1x32xf32, #tpu.memory_space<vmem>>, vector<1x1x32xf32>
    tpu.vector_store %arg7[%c0_16, %c0_17, %c0_18], %23 {strides = array<i32>} : memref<1x1x32xf32, #tpu.memory_space<vmem>>, vector<1x1x32xf32>,
    return
  }
  func.func @transform_0(%arg0: i32) -> (i32, i32) {
    %c0_i32 = arith.constant 0 : i32
    %c0_i32_0 = arith.constant 0 : i32
    return %arg0, %c0_i32 : i32, i32
  }
  func.func @transform_1(%arg0: i32) -> (i32, i32) {
    %c0_i32 = arith.constant 0 : i32
    %c0_i32_0 = arith.constant 0 : i32
    %c0_i32_1 = arith.constant 0 : i32
    return %c0_i32, %c0_i32_0 : i32, i32
  }
  func.func @transform_2(%arg0: i32) -> (i32, i32) {
    %c0_i32 = arith.constant 0 : i32
    %c0_i32_0 = arith.constant 0 : i32
    %c0_i32_1 = arith.constant 0 : i32
    return %c0_i32, %c0_i32_0 : i32, i32
  }
  func.func @transform_3(%arg0: i32) -> (i32, i32) {
    %c0_i32 = arith.constant 0 : i32
    %c0_i32_0 = arith.constant 0 : i32
    %c0_i32_1 = arith.constant 0 : i32
    return %c0_i32, %c0_i32_0 : i32, i32
  }
  func.func @transform_4(%arg0: i32) -> (i32, i32) {
    %c0_i32 = arith.constant 0 : i32
    %c0_i32_0 = arith.constant 0 : i32
    %c0_i32_1 = arith.constant 0 : i32
    return %c0_i32, %c0_i32_0 : i32, i32
  }
  func.func @transform_5(%arg0: i32) -> (i32, i32) {
    %c0_i32 = arith.constant 0 : i32
    %c0_i32_0 = arith.constant 0 : i32
    %c0_i32_1 = arith.constant 0 : i32
    return %c0_i32, %c0_i32_0 : i32, i32
  }
  func.func @transform_6(%arg0: i32) -> (i32, i32, i32) {
    %c0_i32 = arith.constant 0 : i32
    %c0_i32_0 = arith.constant 0 : i32
    %c0_i32_1 = arith.constant 0 : i32
    return %arg0, %c0_i32, %c0_i32_0 : i32, i32, i32
  }
}

</mosaic_0001>

<bundles_post_ra>
// kernel: tpu_custom_call.1
= control target key start
LH: loop header
LB: loop body
LE: loop exit
PB: predicated region body
PF: predicated region fallthrough
CT: control target
= control target key end

     0   :  { %11 = vsyncpa [#allocation3], 0  ;;  %s1473_s0 = inlined_call_operand.vmem [shape: f32[32,32], index: 0, kind: input, shape index: {}]   ;;  %s1474_s1 = inlined_call_operand.vmem [shape: f32[16,16], index: 1, kind: input, shape index: {}]   ;;  %s1475_s2 = inlined_call_operand.vmem [shape: f32[32,512], index: 2, kind: input, shape index: {}]   ;;  %s1476_s3 = inlined_call_operand.vmem [shape: f32[1,512], index: 3, kind: input, shape index: {}]   ;;  %s1477_s4 = inlined_call_operand.vmem [shape: f32[256,32], index: 4, kind: input, shape index: {}]   ;;  %s1478_s5 = inlined_call_operand.vmem [shape: f32[1,16], index: 5, kind: input, shape index: {}]   ;;  %s1479_s6 = inlined_call_operand.hbm [shape: f32[2,1,32], index: 6, kind: output, shape index: {}]  }
   0x1   :  { %13 = vsyncpa [#allocation3 + $0x1], 0  ;;  %s1200_s21 = smov 0   ;;  %s1202_s22 = smov 0  }
   0x2   :  { %s1204_s23 = smov 0   ;;  %s1206_s24 = smov 0  }
   0x3 LB: > { %s1221_s25 = sadd.s32 4294967295, %s1159_s24   ;;  %s902_s26 = sadd.s32 4294967294, %s1159_s24   ;;  %s1159_s24 = sphi %s1206_s24, %s1485_s24   ;;  %s1155_s23 = sphi %s1204_s23, %s1484_s23   ;;  %s1151_s22 = sphi %s1202_s22, %s1483_s22   ;;  %s1147_s21 = sphi %s1200_s21, %s1482_s21  }
   0x4   : > { %s1225_s27 = sadd.s32 1, %s1159_s24   ;;  %s157_s28 = sadd.s32 1, %s1155_s23 }
   0x5   : > { %s154_s29 = ssub.s32 %s1159_s24, %s1225_s27  ;;  %p167_p0 = scmp.ne.s32.totalorder %s1155_s23, %s1151_s22 }
   0x6   : > { %p155_p1 = scmp.eq.s32.totalorder %s154_s29, 0  ;;  %p168_p2 = scmp.eq.s32.totalorder %s1221_s25, 1 }
   0x7   : > { %p173_p3 = scmp.ne.s32.totalorder %s1151_s22, %s1147_s21  ;;  %p174_p4 = scmp.eq.s32.totalorder %s902_s26, 1 }
   0x8   : > { %s1236_s30 = scalar_select %p155_p1, %s1155_s23, %s157_s28  }
   0x9   : > { %p1238_p5 = por %p168_p2, %p167_p0  ;;  %p1242_p6 = por %p174_p4, %p173_p3 }
   0xa   : > { %p905_p7 = scmp.ge.s32.totalorder %s1159_s24, 1  ;;  %p216_p8 = scmp.lt.s32.totalorder %s1159_s24, 3 }
   0xc   : > { %p217_p9 = pnand %p905_p7, %p216_p8 }
   0xd   : > { %v254_v0 = vld [vmem:[%s1475_s2 + $0x8] sm:$0xff] (!%p217_p9)  ;;  %v253_v2 = vld [vmem:[%s1475_s2] sm:$0xff] (!%p217_p9)  ;;  %s906_s15 = sshll.u32 (!%p217_p9), %s1221_s25, 1  ;;  %v1161_v7 = vmov (!%p217_p9), 0.0   ;;  %v256_v12 = vld [vmem:[%s1475_s2 + $0x18] sm:$0xff] (!%p217_p9)  ;;  %vm269_vm0 = vcmask (!%p217_p9), 261120  }
   0xe   : > { %220 = sbr.rel (%p217_p9) target bundleno = 944 (0x3b0), region = 44  ;;  %v258_v1 = vld [vmem:[%s1475_s2 + $0x28] sm:$0xff] (!%p217_p9)  ;;  %v257_v4 = vld [vmem:[%s1475_s2 + $0x20] sm:$0xff] (!%p217_p9)  ;;  %340 = vmatprep.mubr.f32.mxu1 (!%p217_p9), %v1161_v7  ;;  %p246_p10 = scmp.lt.s32.totalorder (!%p217_p9), %s906_s15, 3  ;;  %525 = vmatprep.mubr.f32.mxu0 (!%p217_p9), %v1161_v7  ;;  %v260_v13 = vld [vmem:[%s1475_s2 + $0x38] sm:$0xff] (!%p217_p9)  ;;  %vm454_vm1 = vcmask (!%p217_p9), 130048  }
   0xf   : > { %v972_v3 = vpack.c.bf16 (!%p217_p9), %v258_v1, %v254_v0  ;;  %v262_v5 = vld [vmem:[%s1475_s2 + $0x48] sm:$0xff] (!%p217_p9)  ;;  %v974_v8 = vpack.c.bf16 (!%p217_p9), %v257_v4, %v253_v2  ;;  %v261_v10 = vld [vmem:[%s1475_s2 + $0x40] sm:$0xff] (!%p217_p9)  ;;  %v980_v15 = vpack.c.bf16 (!%p217_p9), %v260_v13, %v256_v12  ;;  %v255_v16 = vld [vmem:[%s1475_s2 + $0x10] sm:$0xff] (!%p217_p9)  ;;  %vm1163_vm2 = vmmov (!%p217_p9), 0   ;;  %s243_s13 = sand.u32 (!%p217_p9), 1, %s1151_s22   ;;  %s921_s14 = sshll.u32 (!%p217_p9), %s1221_s25, 4 }
  0x10   : > { %v266_v6 = vld [vmem:[%s1475_s2 + $0x68] sm:$0xff] (!%p217_p9)  ;;  %v265_v11 = vld [vmem:[%s1475_s2 + $0x60] sm:$0xff] (!%p217_p9)  ;;  %v259_v17 = vld [vmem:[%s1475_s2 + $0x30] sm:$0xff] (!%p217_p9)  ;;  %vm832_vm3 = vcmask (!%p217_p9), 253952   ;;  %s1431_s20 = scalar_lea.hbm (!%p217_p9), %s1479_s6, %s921_s14  ;;  %s835_s26 = scalar_lea.sflag (!%p217_p9), [#allocation3], %s243_s13 }
  0x11   : > { %v976_v9 = vpack.c.bf16 (!%p217_p9), %v266_v6, %v262_v5  ;;  %973 = vmatprep.subr.bf16.mxu1 (!%p217_p9), %v972_v3  ;;  %v978_v14 = vpack.c.bf16 (!%p217_p9), %v265_v11, %v261_v10  ;;  %v264_v18 = vld [vmem:[%s1475_s2 + $0x58] sm:$0xff] (!%p217_p9)  ;;  %v982_v21 = vpack.c.bf16 (!%p217_p9), %v259_v17, %v255_v16  ;;  %v263_v23 = vld [vmem:[%s1475_s2 + $0x50] sm:$0xff] (!%p217_p9)  ;;  %v430_v34 = vld [vmem:[%s1474_s1] sm:$0xff] (!%p217_p9)  ;;  %s1164_s25 = smov (!%p217_p9), [#allocation2]  }
  0x12   : > { %975 = vmatpush1.bf16.msra.mxu1 (!%p217_p9), %v974_v8  ;;  %v268_v19 = vld [vmem:[%s1475_s2 + $0x78] sm:$0xff] (!%p217_p9)  ;;  %v267_v24 = vld [vmem:[%s1475_s2 + $0x70] sm:$0xff] (!%p217_p9)  ;;  %v431_v39 = vld [vmem:[%s1474_s1 + $0x8] sm:$0xff] (!%p217_p9) }
  0x13   : > { %977 = vmatprep.subr.bf16.mxu1 (!%p217_p9), %v976_v9  ;;  %v984_v22 = vpack.c.bf16 (!%p217_p9), %v268_v19, %v264_v18  ;;  %v986_v26 = vpack.c.bf16 (!%p217_p9), %v267_v24, %v263_v23  ;;  %v667_v41 = vld [vmem:[%s1477_s4 + $0x80] sm:$0xff] (!%p217_p9)  ;;  %v668_v42 = vld [vmem:[%s1477_s4 + $0x88] sm:$0xff] (!%p217_p9)  ;;  %v669_v47 = vld [vmem:[%s1477_s4 + $0x90] sm:$0xff] (!%p217_p9) }
  0x14   : > { %v996_v43 = vpack.c.bf16 (!%p217_p9), %v668_v42, %v667_v41  ;;  %v651_v44 = vld [vmem:[%s1477_s4] sm:$0xff] (!%p217_p9)  ;;  %v652_v45 = vld [vmem:[%s1477_s4 + $0x8] sm:$0xff] (!%p217_p9)  ;;  %v670_v48 = vld [vmem:[%s1477_s4 + $0x98] sm:$0xff] (!%p217_p9) }
  0x15   : > { %s1487_s15 = smov (!%p246_p10, %s906_s15), 3  ;;  %v998_v46 = vpack.c.bf16 %v652_v45, %v651_v44  ;;  %v1000_v49 = vpack.c.bf16 %v670_v48, %v669_v47  ;;  %v653_v50 = vld [vmem:[%s1477_s4 + $0x10] sm:$0xff]  ;;  %v654_v51 = vld [vmem:[%s1477_s4 + $0x18] sm:$0xff]  ;;  %v671_v53 = vld [vmem:[%s1477_s4 + $0xa0] sm:$0xff] }
  0x16   : > { %s907_s16 = sshll.u32 %s1487_s15, 3  ;;  %979 = vmatpush1.bf16.msra.mxu1 %v978_v14  ;;  %v1002_v52 = vpack.c.bf16 %v654_v51, %v653_v50  ;;  %v672_v54 = vld [vmem:[%s1477_s4 + $0xa8] sm:$0xff]  ;;  %v655_v56 = vld [vmem:[%s1477_s4 + $0x20] sm:$0xff]  ;;  %v673_v59 = vld [vmem:[%s1477_s4 + $0xb0] sm:$0xff] }
  0x17   : > { %s249_s29 = scalar_lea.vmem %s1473_s0, %s907_s16  ;;  %981 = vmatprep.subr.bf16.mxu1 %v980_v15  ;;  %v1004_v55 = vpack.c.bf16 %v672_v54, %v671_v53  ;;  %v656_v57 = vld [vmem:[%s1477_s4 + $0x28] sm:$0xff]  ;;  %v674_v60 = vld [vmem:[%s1477_s4 + $0xb8] sm:$0xff]  ;;  %v657_v62 = vld [vmem:[%s1477_s4 + $0x30] sm:$0xff]  ;;  %s244_s16 = scalar_lea.vmem [#allocation2], %s243_s13 }
  0x18   : > { %v251_v20 = vld [vmem:[%s249_s29] sm:$0xff]  ;;  %v252_v25 = vld [vmem:[%s249_s29 + $0x8] sm:$0xff]  ;;  %v1006_v58 = vpack.c.bf16 %v656_v57, %v655_v56  ;;  %v1008_v61 = vpack.c.bf16 %v674_v60, %v673_v59  ;;  %v658_v63 = vld [vmem:[%s1477_s4 + $0x38] sm:$0xff]  ;;  %s847_s17 = sshll.u32 %s244_s16, 4  ;;  %s1101_s29 = sshll.u32 %s1164_s25, 4  ;;  %s1433_s17 = int_to_ptr.vmem [resolvable:$true] %s847_s17  ;;  %s1102_s29 = int_to_ptr.vmem [resolvable:$false] %s1101_s29 }
  0x19   : > { %908 = vmatmul.mubr.msk.f32.vlgmr.msra.gmra.mrb[0].mxu1 %vm269_vm0, %v251_v20  ;;  %v1010_v0 = vpack.c.bf16 %v658_v63, %v657_v62  ;;  %v675_v1 = vld [vmem:[%s1477_s4 + $0xc0] sm:$0xff]  ;;  %v676_v2 = vld [vmem:[%s1477_s4 + $0xc8] sm:$0xff]  ;;  %v677_v8 = vld [vmem:[%s1477_s4 + $0xd0] sm:$0xff]  ;;  %s1097_s28 = scalar_lea.vmem %s1433_s17, 16  ;;  %s1103_s9 = scalar_lea.vmem %s1102_s29, 32 }
  0x1a   : > { %346 = vmatprep.mubr.f32.mxu1 %v1161_v7  ;;  %983 = vmatpush1.bf16.msra.mxu1 %v982_v21  ;;  %v1012_v3 = vpack.c.bf16 %v676_v2, %v675_v1  ;;  %v659_v4 = vld [vmem:[%s1477_s4 + $0x40] sm:$0xff]  ;;  %v660_v5 = vld [vmem:[%s1477_s4 + $0x48] sm:$0xff]  ;;  %v678_v9 = vld [vmem:[%s1477_s4 + $0xd8] sm:$0xff]  ;;  %p1098_p11 = scmp.ne.s32.totalorder %s1433_s17, %s1097_s28  ;;  %p1104_p0 = scmp.lt.s32.totalorder %s1433_s17, %s1102_s29 }
  0x1b   : > { %985 = vmatprep.subr.bf16.mxu1 %v984_v22  ;;  %v1014_v6 = vpack.c.bf16 %v660_v5, %v659_v4  ;;  %v1016_v10 = vpack.c.bf16 %v678_v9, %v677_v8  ;;  %v661_v11 = vld [vmem:[%s1477_s4 + $0x50] sm:$0xff]  ;;  %v662_v12 = vld [vmem:[%s1477_s4 + $0x58] sm:$0xff]  ;;  %v679_v14 = vld [vmem:[%s1477_s4 + $0xe0] sm:$0xff]  ;;  %p1105_p1 = scmp.lt.s32.totalorder %s1103_s9, %s1097_s28 }
  0x1c   : > { %v1018_v13 = vpack.c.bf16 %v662_v12, %v661_v11  ;;  %v680_v15 = vld [vmem:[%s1477_s4 + $0xe8] sm:$0xff]  ;;  %v663_v17 = vld [vmem:[%s1477_s4 + $0x60] sm:$0xff]  ;;  %v682_v21 = vld [vmem:[%s1477_s4 + $0xf8] sm:$0xff]  ;;  %p1099_p12 = pnand %p1098_p11, %p1238_p5 }
  0x1d   : > { %909 = vmatmul.mubr.msk.f32.gmra.mrb[2].mxu1 %vm269_vm0, %v252_v25  ;;  %v1020_v16 = vpack.c.bf16 %v680_v15, %v679_v14  ;;  %v664_v18 = vld [vmem:[%s1477_s4 + $0x68] sm:$0xff]  ;;  %v665_v23 = vld [vmem:[%s1477_s4 + $0x70] sm:$0xff]  ;;  %v666_v24 = vld [vmem:[%s1477_s4 + $0x78] sm:$0xff]  ;;  %p1106_p2 = por %p1105_p1, %p1104_p0 }
  0x1e   : > { %987 = vmatpush1.bf16.msra.mxu1 %v986_v26  ;;  %417 = vmatprep.mubr.f32.mxu1 %v1161_v7  ;;  %v1022_v19 = vpack.c.bf16 %v664_v18, %v663_v17  ;;  %v434_v26 = vlaneseq  ;;  %v1162_v18 = vmov 0.0|0.0   ;;  %p1100_p13 = pneg %p1099_p12 }
  0x20   : > { %p1107_p3 = pnand %p1106_p2, %p1100_p13 }
  0x21   : > { %910 = vmatmul.mubr.msk.f32.vlgmr.msra.gmra.mrb[4].mxu1 %vm269_vm0, %v251_v20  ;;  %v681_v20 = vld [vmem:[%s1477_s4 + $0xf0] sm:$0xff] }
  0x22   : > { %423 = vmatprep.mubr.f32.mxu1 %v1161_v7  ;;  %v1024_v22 = vpack.c.bf16 %v682_v21, %v681_v20 }
  0x25   : > { %911 = vmatmul.mubr.msk.f32.gmra.mrb[6].mxu1 %vm269_vm0, %v252_v25  ;;  %v1026_v25 = vpack.c.bf16 %v666_v24, %v665_v23 }
  0x26   : > { %602 = vmatprep.mubr.f32.mxu1 %v1161_v7 }
  0xec   : > { %v342_v27 = vpop.f32.mrb[0].mxu1 }
  0xed   : > { %v344_v28 = vpop.f32.mrb[1].mxu1 }
  0xf0   : > { %v348_v29 = vpop.f32.mrb[2].mxu1 }
  0xf1   : > { %v990_v30 = vpack.c.bf16 %v348_v29, %v342_v27  ;;  %v350_v31 = vpop.f32.mrb[3].mxu1  ;;  %v435_v27 = vshrl.u32 %v434_v26, 7  ;;  %v432_v29 = vld [vmem:[%s1476_s3] sm:$0xf] }
  0xf2   : > { %v988_v32 = vpack.c.bf16 %v350_v31, %v344_v28  ;;  %v758_v26 = vld [vmem:[%s1478_s5] sm:$0x1] }
  0xf3   : > { %v436_v28 = vsub.s32 0, %v435_v27 }
  0xf4   : > { %989 = vmatprep.subr.bf16.mxu0 %v988_v32  ;;  %v419_v33 = vpop.f32.mrb[4].mxu1 }
  0xf5   : > { %991 = vmatpush1.bf16.msra.mxu0 %v990_v30  ;;  %v421_v35 = vpop.f32.mrb[5].mxu1  ;;  %v440_v30 = vsub.s32 1, %v435_v27  ;;  %v437_v31 = vrot.slane %v432_v29, %v436_v28 }
  0xf6   : > { %997 = vmatprep.subr.bf16.mxu0 %v996_v43  ;;  %v448_v43 = vsub.s32 3, %v435_v27 }
  0xf7   : > { %v441_v32 = vrot.slane %v432_v29, %v440_v30 }
  0xf8   : > { %912 = vmatmul.mubr.msk.f32.vlgmr.msra.gmra.mrb[0].mxu0 %vm454_vm1, %v430_v34  ;;  %v425_v36 = vpop.f32.mrb[6].mxu1 }
  0xf9   : > { %v994_v37 = vpack.c.bf16 %v425_v36, %v419_v33  ;;  %531 = vmatprep.mubr.f32.mxu0 %v1161_v7  ;;  %v427_v38 = vpop.f32.mrb[7].mxu1  ;;  %999 = vmatpush3.bf16.msra.mxu0 %v998_v46 }
  0xfa   : > { %v992_v40 = vpack.c.bf16 %v427_v38, %v421_v35  ;;  %1001 = vmatprep.subr.bf16.mxu0 %v1000_v49  ;;  %v449_v49 = vrot.slane %v432_v29, %v448_v43 }
  0xfc   : > { %913 = vmatmul.mubr.msk.f32.gmra.mrb[2].mxu0 %vm454_vm1, %v431_v39  ;;  %993 = vmatprep.subr.bf16.mxu1 %v992_v40  ;;  %v444_v40 = vsub.s32 2, %v435_v27 }
  0xfd   : > { %995 = vmatpush1.bf16.msra.mxu1 %v994_v37  ;;  %1003 = vmatpush3.bf16.msra.mxu0 %v1002_v52 }
  0xfe   : > { %1005 = vmatprep.subr.bf16.mxu0 %v1004_v55  ;;  %v445_v47 = vrot.slane %v432_v29, %v444_v40  ;;  %1028 = vmatprep.subr.bf16.mxu1 %v1162_v18 }
 0x100   : > { %914 = vmatmul.mubr.msk.f32.vlgmr.msra.gmra.mrb[8].mxu1 %vm454_vm1, %v430_v34 }
 0x101   : > { %608 = vmatprep.mubr.f32.mxu1 %v1161_v7  ;;  %1007 = vmatpush3.bf16.msra.mxu0 %v1006_v58 }
 0x102   : > { %1009 = vmatprep.subr.bf16.mxu0 %v1008_v61 }
 0x104   : > { %915 = vmatmul.mubr.msk.f32.gmra.mrb[10].mxu1 %vm454_vm1, %v431_v39 }
 0x105   : > { %1011 = vmatpush3.bf16.msra.mxu0 %v1010_v0  ;;  %969 = vmatprep.mubr.msk.f32.mxu1 %vm1163_vm2, %v1161_v7 }
 0x106   : > { %1013 = vmatprep.subr.bf16.mxu0 %v1012_v3 }
 0x109   : > { %1015 = vmatpush3.bf16.msra.mxu0 %v1014_v6 }
 0x10a   : > { %1017 = vmatprep.subr.bf16.mxu0 %v1016_v10 }
 0x10d   : > { %1019 = vmatpush3.bf16.msra.mxu0 %v1018_v13 }
 0x10e   : > { %1021 = vmatprep.subr.bf16.mxu0 %v1020_v16 }
 0x111   : > { %1023 = vmatpush3.bf16.msra.mxu0 %v1022_v19 }
 0x112   : > { %1025 = vmatprep.subr.bf16.mxu0 %v1024_v22 }
 0x115   : > { %1027 = vmatpush3.bf16.msra.mxu0 %v1026_v25 }
 0x1cb   : > { %v527_v33 = vpop.f32.mrb[0].mxu0 }
 0x1cc   : > { %v528_v34 = vadd.f32 %v527_v33, %v437_v31  ;;  %v529_v35 = vpop.f32.mrb[1].mxu0 }
 0x1cd   : > { %v530_v36 = vadd.f32 %v529_v35, %v441_v32 }
 0x1ce   : > { %v916_v37 = vmul.f32 -1.442695, %v528_v34 }
 0x1cf   : > { %v917_v38 = vmul.f32 -1.442695, %v530_v36  ;;  %v533_v39 = vpop.f32.mrb[2].mxu0 }
 0x1d0   : > { %1073 = vpow2.f32 %v916_v37  ;;  %v534_v41 = vadd.f32 %v533_v39, %v437_v31  ;;  %v535_v42 = vpop.f32.mrb[3].mxu0 }
 0x1d1   : > { %1075 = vpow2.f32 %v917_v38  ;;  %v536_v44 = vadd.f32 %v535_v42, %v441_v32 }
 0x1d2   : > { %v918_v45 = vmul.f32 -1.442695, %v534_v41 }
 0x1d3   : > { %v919_v46 = vmul.f32 -1.442695, %v536_v44  ;;  %v604_v48 = vpop.f32.mrb[8].mxu1 }
 0x1d4   : > { %1077 = vpow2.f32 %v918_v45  ;;  %v606_v50 = vpop.f32.mrb[9].mxu1  ;;  %v605_v51 = vadd.f32 %v604_v48, %v445_v47 }
 0x1d5   : > { %1079 = vpow2.f32 %v919_v46  ;;  %v607_v53 = vadd.f32 %v606_v50, %v449_v49 }
 0x1d6   : > { %1081 = vtanh.f32 %v605_v51 }
 0x1d7   : > { %v610_v52 = vpop.f32.mrb[10].mxu1  ;;  %1083 = vtanh.f32 %v607_v53 }
 0x1d8   : > { %v612_v54 = vpop.f32.mrb[11].mxu1  ;;  %v611_v58 = vadd.f32 %v610_v52, %v445_v47 }
 0x1d9   : > { %v613_v60 = vadd.f32 %v612_v54, %v449_v49 }
 0x1da   : > { %v1074_v55 = vpop.eup %1073 }
 0x1db   : > { %v1076_v56 = vpop.eup %1075  ;;  %v627_v57 = vadd.f32 1.0, %v1074_v55 }
 0x1dc   : > { %v628_v59 = vadd.f32 1.0, %v1076_v56 }
 0x1dd   : > { %1085 = vrcp.f32 %v627_v57 }
 0x1de   : > { %v1078_v61 = vpop.eup %1077  ;;  %1087 = vrcp.f32 %v628_v59 }
 0x1df   : > { %v1080_v62 = vpop.eup %1079  ;;  %v629_v63 = vadd.f32 1.0, %v1078_v61  ;;  %1089 = vtanh.f32 %v611_v58 }
 0x1e0   : > { %v630_v0 = vadd.f32 1.0, %v1080_v62  ;;  %1091 = vtanh.f32 %v613_v60  ;;  %v1082_v1 = vpop.eup %1081 }
 0x1e1   : > { %1093 = vrcp.f32 %v629_v63  ;;  %v1084_v2 = vpop.eup %1083 }
 0x1e2   : > { %1095 = vrcp.f32 %v630_v0 }
 0x1e7   : > { %v1086_v3 = vpop.eup %1085 }
 0x1e8   : > { %v1088_v4 = vpop.eup %1087  ;;  %v643_v5 = vsub.f32 1.0, %v1086_v3 }
 0x1e9   : > { %v1090_v6 = vpop.eup %1089  ;;  %v644_v8 = vsub.f32 1.0, %v1088_v4 }
 0x1ea   : > { %v1092_v9 = vpop.eup %1091  ;;  %v647_v10 = vmul.f32 %v1082_v1, %v643_v5 }
 0x1eb   : > { %v1094_v11 = vpop.eup %1093  ;;  %v648_v12 = vmul.f32 %v1084_v2, %v644_v8 }
 0x1ec   : > { %v1096_v13 = vpop.eup %1095  ;;  %v645_v14 = vsub.f32 1.0, %v1094_v11 }
 0x1ed   : > { %747 = vmatprep.mubr.f32.mxu0 %v648_v12  ;;  %v646_v15 = vsub.f32 1.0, %v1096_v13 }
 0x1ee   : > { %748 = vmatmul.mubr.f32.vlgmr.msra.gmra.mrb[4].mxu0 %v647_v10  ;;  %v649_v16 = vmul.f32 %v1090_v6, %v645_v14 }
 0x1ef   : > { %v650_v17 = vmul.f32 %v1092_v9, %v646_v15 }
 0x1f1   : > { %752 = vmatprep.mubr.f32.mxu0 %v650_v17 }
 0x1f2   : > { %753 = vmatmul.mubr.f32.gmra.mrb[6].mxu0 %v649_v16 }
 0x2c1   : > { %v956_v19 = vpop.f32.mrb[4].mxu0 }
 0x2c2   : > { %v957_v20 = vpop.f32.mrb[5].mxu0 }
 0x2c3   : > { %v958_v21 = vadd.f32 %v957_v20, %v956_v19 }
 0x2c5   : > { %v959_v22 = vpop.f32.mrb[6].mxu0 }
 0x2c6   : > { %v960_v23 = vpop.f32.mrb[7].mxu0 }
 0x2c7   : > { %v961_v24 = vadd.f32 %v960_v23, %v959_v22 }
 0x2c9   : > { %v1029_v25 = vpack.c.bf16 %v961_v24, %v958_v21 }
 0x2cb   : > { %1030 = vmatpush3.bf16.msra.mxu1 %v1029_v25 }
 0x2ce   : > { %970 = vmatmul.mubr.msk.f32.vlgmr.msra.gmra.mrb[12].mxu1 %vm454_vm1, %v758_v26 }
 0x3a1   : > { %v828_v7 = vpop.f32.mrb[12].mxu1 }
 0x3a2   : > { %833 = vst.msk [vmem:[%s244_s16] sm:$0x1] %vm832_vm3, %v828_v7  ;;  %v971_v27 = vpop.f32.mrb[13].mxu1 }
 0x3a3   : > { %1110 = shalt.err (!%p1107_p3)
}
 0x3a4   : > { %s1111_s10 = scalar_lea.hbm %s1431_s20, 16  ;;  %s1115_s15 = scalar_lea.hbm %s1479_s6, 32 }
 0x3a5   : > { %p1112_p4 = scmp.ne.s32.totalorder %s1431_s20, %s1111_s10  ;;  %p1116_p9 = scmp.lt.u32.totalorder %s1431_s20, %s1479_s6 }
 0x3a6   : > { %p1117_p10 = scmp.lt.u32.totalorder %s1115_s15, %s1111_s10  ;;  %p1119_p12 = scmp.lt.u32.totalorder %s1111_s10, %s1431_s20 }
 0x3a7   : > { %p1113_p7 = pnand %p1112_p4, %p1238_p5 }
 0x3a8   : > { %p1118_p11 = por %p1117_p10, %p1116_p9 }
 0x3a9   : > { %p1114_p8 = pneg %p1113_p7 }
 0x3aa   : > { %p1120_p13 = por %p1119_p12, %p1118_p11 }
 0x3ac   : > { %p1121_p0 = pnand %p1120_p13, %p1114_p8 }
 0x3ae   : > { %1124 = shalt.err (!%p1121_p0)
}
 0x3af   : > { %1031 = dma.vmem_to_hbm [thread:$0]  (%p1238_p5), %s1433_s17, 16, %s1431_s20, %s835_s26  }
 0x3b0 PF: > { %p1037_p1 = scmp.ge.s32.totalorder %s1159_s24, 2  ;;  %s859_s16 = sand.u32 1, %s1147_s21  }
 0x3b1   : > { %s860_s18 = scalar_lea.sflag [#allocation3], %s859_s16 }
 0x3b2   : > { %p1034_p2 = pnand %p1037_p1, %p1242_p6 }
 0x3b4   : > { %1142 = dma.done.wait (!%p1034_p2), %s860_s18, 16  }
 0x3b5   : > { %1144 = vsyncadd (!%p1034_p2), %s860_s18, 4294967280  ;;  %p16_p3 = scmp.ge.s32.totalorder %s1225_s27, 4   ;;  %s1482_s21 = smov %s1151_s22 }
 0x3b6   : > { %s1483_s22 = smov %s1155_s23  ;;  %s1484_s23 = smov %s1236_s30 }
 0x3b7   : > { %s1485_s24 = smov %s1225_s27  ;;  %18 = sbr.rel (!%p16_p3) target bundleno = 3 (0x3), region = 79 }
 0x3be   :  { %864 = vsyncpa [#allocation3], 1 }
 0x3bf   :  { %866 = vsyncpa [#allocation3 + $0x1], 1 }

</bundles_post_ra>
